<compile_context>
chip_gen: v5e
topology: v5e:2x2
jax: 0.10.0
libtpu: 0.0.40
codegen_flags: <defaults>
</compile_context>

<pallas_src>
import functools

import jax
import jax.numpy as jnp
from jax import lax
from jax.experimental import pallas as pl
from jax.experimental.pallas import tpu as pltpu


def _celoss_kernel(probs_ref, tgt_ref, nll_ref, acc_ref, *, tile_c):
    k = pl.program_id(1)  # class-tile index (innermost reduction axis)

    @pl.when(k == 0)
    def _():
        acc_ref[...] = jnp.zeros_like(acc_ref)

    probs = probs_ref[...]                                  # (tm, tc), native dtype
    # Fold the class-tile offset into the (tm, 1) target instead of adding it to a full-tile
    # iota: removes ~tm*tc VALU adds per step.  Targets outside this tile become negative or
    # >= the valid local range, so they (and padded columns) can never match.
    tgt_local = tgt_ref[...] - k * tile_c                   # (tm, 1) int32
    col = lax.broadcasted_iota(jnp.int32, probs.shape, 1)   # local lane index 0..tc-1
    picked = jnp.where(col == tgt_local, probs, jnp.zeros_like(probs))      # VPU select
    # Reduce in native dtype (exact: all but one summand is exactly 0), upcast the (tm, 1)
    # partial sum only.
    acc_ref[...] += jnp.sum(picked, axis=1, keepdims=True).astype(jnp.float32)  # XLU reduce

    @pl.when(k == pl.num_programs(1) - 1)
    def _():
        nll_ref[...] = -jnp.log(acc_ref[...])               # EUP work: tile_m values only


def _round_up(x, m):
    return ((x + m - 1) // m) * m


def ce_loss(output, target, *, tile_m=None, tile_c=None,
            vmem_limit_bytes=48 * 1024 * 1024):
    """loss = F.nll_loss(log(output), target), mean reduction.

    output: (N, C) float class probabilities (kept in native dtype).
    target: (N,)   integer class indices.
    """
    N, C = output.shape
    itemsize = jnp.dtype(output.dtype).itemsize
    sub = 8 if itemsize >= 4 else (16 if itemsize == 2 else 32)  # sublane multiple per dtype

    # Class tile: bias toward a wide lane-contiguous block (fewer reduction steps, same
    # per-row accumulator footprint).  tc == C (full dim) is always a legal block width.
    tc = tile_c if tile_c is not None else min(4096, C)

    # Row tile: 512 for big batches; for small batches shrink so the "parallel" row axis has
    # at least 2 tiles (keeps both v7x TensorCores fed).  tm is either a sublane multiple or
    # the full row extent, so the (8, 128) block rule always holds.
    if tile_m is not None:
        tm = tile_m
    elif N <= 2 * 512:
        tm = min(N, _round_up(pl.cdiv(N, 2), sub))
    else:
        tm = 512

    grid = (pl.cdiv(N, tm), pl.cdiv(C, tc))   # reduction (class) axis innermost
    n_row_pad = grid[0] * tm                  # output padded so its blocks divide exactly

    tgt2d = target.reshape(N, 1).astype(jnp.int32)

    kernel = functools.partial(_celoss_kernel, tile_c=tc)
    per_row_nll = pl.pallas_call(
        kernel,
        out_shape=jax.ShapeDtypeStruct((n_row_pad, 1), jnp.float32),
        grid_spec=pltpu.PrefetchScalarGridSpec(
            num_scalar_prefetch=0,
            grid=grid,
            in_specs=[
                pl.BlockSpec((tm, tc), lambda i, k: (i, k)),   # probabilities (streamed)
                pl.BlockSpec((tm, 1), lambda i, k: (i, 0)),    # targets (resident over k)
            ],
            out_specs=pl.BlockSpec((tm, 1), lambda i, k: (i, 0)),  # resident over k
            scratch_shapes=[pltpu.VMEM((tm, 1), jnp.float32)],     # per-row picked-prob acc
        ),
        compiler_params=pltpu.CompilerParams(
            dimension_semantics=("parallel", "arbitrary"),
            vmem_limit_bytes=vmem_limit_bytes,
        ),
    )(output, tgt2d)

    # Padded rows (rows >= N of the padded output) may hold garbage -log values; slice them
    # off before the mean.  Everything else is exact, so sum / N is the exact mean NLL.
    return jnp.sum(per_row_nll[:N, 0]) / jnp.float32(N)


if __name__ == "__main__":
    key = jax.random.PRNGKey(0)
    k1, k2, k3, k4 = jax.random.split(key, 4)

    # Case 1: default tiles (f32).  N=24 -> tm=16 (two row tiles: exercises the parallel row
    # axis + the wrapper-side row-padding slice), tc=C=300 (single class tile).
    N1, C1 = 24, 300
    probs1 = jax.nn.softmax(jax.random.normal(k1, (N1, C1), dtype=jnp.float32), axis=-1)
    tgt1 = jax.random.randint(k2, (N1,), 0, C1, dtype=jnp.int32)
    loss1 = ce_loss(probs1, tgt1)

    # Case 2: explicit small tiles -> 3x3 grid: partial last row tile, partial last class
    # tile (column padding) and multi-step class-axis accumulation.
    N2, C2 = 20, 300
    probs2 = jax.nn.softmax(jax.random.normal(k3, (N2, C2), dtype=jnp.float32), axis=-1)
    tgt2 = jax.random.randint(k4, (N2,), 0, C2, dtype=jnp.int32)
    loss2 = ce_loss(probs2, tgt2, tile_m=8, tile_c=128)

    # Case 3: bf16 probabilities streamed natively (dtype-aware tiles, native-dtype reduce).
    probs3 = probs1.astype(jnp.bfloat16)
    loss3 = ce_loss(probs3, tgt1)

    jax.block_until_ready((loss1, loss2, loss3))

    # Pure-JAX references: nll_loss(log(p), t), mean reduction.
    ref1 = -jnp.mean(jnp.log(probs1)[jnp.arange(N1), tgt1])
    ref2 = -jnp.mean(jnp.log(probs2)[jnp.arange(N2), tgt2])
    ref3 = -jnp.mean(jnp.log(probs3.astype(jnp.float32))[jnp.arange(N1), tgt1])
    assert jnp.allclose(loss1, ref1, atol=1e-5, rtol=1e-5), (loss1, ref1)
    assert jnp.allclose(loss2, ref2, atol=1e-5, rtol=1e-5), (loss2, ref2)
    assert jnp.allclose(loss3, ref3, atol=1e-5, rtol=1e-5), (loss3, ref3)

    print("KERNEL_OK")
</pallas_src>

<mosaic_0001>
module attributes {stable_mosaic.version = 11 : i64} {
  func.func @_celoss_kernel(%arg0: i32, %arg1: i32, %arg2: memref<16x300xf32, #tpu.memory_space<vmem>>, %arg3: memref<16x1xi32, #tpu.memory_space<vmem>>, %arg4: memref<16x1xf32, #tpu.memory_space<vmem>>, %arg5: memref<16x1xf32, #tpu.memory_space<vmem>>) attributes {dimension_semantics = [#tpu.dimension_semantics<parallel>, #tpu.dimension_semantics<arbitrary>], iteration_bounds = array<i64: 2, 1>, scalar_prefetch = 0 : i64, scratch_operands = 1 : i64, tpu.core_type = #tpu.core_type<tc>, window_params = [{transform_indices = @transform_0, window_bounds = array<i64: 16, 300>}, {transform_indices = @transform_1, window_bounds = array<i64: 16, 1>}, {transform_indices = @transform_2, window_bounds = array<i64: 16, 1>}]} {
    %c0_i32 = arith.constant 0 : i32
    %0 = arith.cmpi eq, %arg1, %c0_i32 : i32
    %1 = arith.extui %0 : i1 to i32
    %c0_i32_0 = arith.constant 0 : i32
    %2 = arith.cmpi ne, %1, %c0_i32_0 : i32
    scf.if %2 {
      %cst_11 = arith.constant 0.000000e+00 : f32
      %21 = vector.broadcast %cst_11 : f32 to vector<16x1xf32>
      %c0_12 = arith.constant 0 : index
      %c0_13 = arith.constant 0 : index
      %22 = vector.load %arg5[%c0_12, %c0_13] : memref<16x1xf32, #tpu.memory_space<vmem>>, vector<16x1xf32>
      tpu.vector_store %arg5[%c0_12, %c0_13], %21 {strides = array<i32>} : memref<16x1xf32, #tpu.memory_space<vmem>>, vector<16x1xf32>,
    } else {
    }
    %c0 = arith.constant 0 : index
    %c0_1 = arith.constant 0 : index
    %3 = vector.load %arg2[%c0, %c0_1] : memref<16x300xf32, #tpu.memory_space<vmem>>, vector<16x300xf32>
    %c0_2 = arith.constant 0 : index
    %c0_3 = arith.constant 0 : index
    %4 = vector.load %arg3[%c0_2, %c0_3] : memref<16x1xi32, #tpu.memory_space<vmem>>, vector<16x1xi32>
    %c300_i32 = arith.constant 300 : i32
    %5 = arith.muli %arg1, %c300_i32 : i32
    %6 = vector.broadcast %5 : i32 to vector<16x1xi32>
    %7 = arith.subi %4, %6 : vector<16x1xi32>
    %8 = tpu.iota {dimensions = array<i32: 1>} : vector<16x300xi32>
    %9 = vector.broadcast %7 : vector<16x1xi32> to vector<16x300xi32>
    %10 = arith.cmpi eq, %8, %9 : vector<16x300xi32>
    %cst = arith.constant 0.000000e+00 : f32
    %11 = vector.broadcast %cst : f32 to vector<16x300xf32>
    %12 = arith.select %10, %3, %11 : vector<16x300xi1>, vector<16x300xf32>
    %c0_4 = arith.constant 0 : index
    %c0_5 = arith.constant 0 : index
    %13 = vector.load %arg5[%c0_4, %c0_5] : memref<16x1xf32, #tpu.memory_space<vmem>>, vector<16x1xf32>
    %cst_6 = arith.constant dense<0.000000e+00> : vector<16xf32>
    %14 = vector.multi_reduction <add>, %12, %cst_6 [1] : vector<16x300xf32> to vector<16xf32>
    %15 = vector.shape_cast %14 : vector<16xf32> to vector<16x1xf32>
    %16 = arith.addf %13, %15 : vector<16x1xf32>
    %c0_7 = arith.constant 0 : index
    %c0_8 = arith.constant 0 : index
    %17 = vector.load %arg5[%c0_7, %c0_8] : memref<16x1xf32, #tpu.memory_space<vmem>>, vector<16x1xf32>
    tpu.vector_store %arg5[%c0_7, %c0_8], %16 {strides = array<i32>} : memref<16x1xf32, #tpu.memory_space<vmem>>, vector<16x1xf32>,
    %c0_i32_9 = arith.constant 0 : i32
    %18 = arith.cmpi eq, %arg1, %c0_i32_9 : i32
    %19 = arith.extui %18 : i1 to i32
    %c0_i32_10 = arith.constant 0 : i32
    %20 = arith.cmpi ne, %19, %c0_i32_10 : i32
    scf.if %20 {
      %c0_11 = arith.constant 0 : index
      %c0_12 = arith.constant 0 : index
      %21 = vector.load %arg5[%c0_11, %c0_12] : memref<16x1xf32, #tpu.memory_space<vmem>>, vector<16x1xf32>
      %22 = math.log %21 : vector<16x1xf32>
      %cst_13 = arith.constant 0.000000e+00 : f32
      %23 = vector.broadcast %cst_13 : f32 to vector<16x1xf32>
      %24 = arith.subf %23, %22 : vector<16x1xf32>
      %c0_14 = arith.constant 0 : index
      %c0_15 = arith.constant 0 : index
      %25 = vector.load %arg4[%c0_14, %c0_15] : memref<16x1xf32, #tpu.memory_space<vmem>>, vector<16x1xf32>
      tpu.vector_store %arg4[%c0_14, %c0_15], %24 {strides = array<i32>} : memref<16x1xf32, #tpu.memory_space<vmem>>, vector<16x1xf32>,
    } else {
    }
    return
  }
  func.func @transform_0(%arg0: i32, %arg1: i32) -> (i32, i32) {
    %c0_i32 = arith.constant 0 : i32
    return %arg0, %arg1 : i32, i32
  }
  func.func @transform_1(%arg0: i32, %arg1: i32) -> (i32, i32) {
    %c0_i32 = arith.constant 0 : i32
    %c0_i32_0 = arith.constant 0 : i32
    return %arg0, %c0_i32 : i32, i32
  }
  func.func @transform_2(%arg0: i32, %arg1: i32) -> (i32, i32) {
    %c0_i32 = arith.constant 0 : i32
    %c0_i32_0 = arith.constant 0 : i32
    return %arg0, %c0_i32 : i32, i32
  }
}

</mosaic_0001>

<bundles_post_ra>
// kernel: tpu_custom_call.1
= control target key start
LH: loop header
LB: loop body
LE: loop exit
PB: predicated region body
PF: predicated region fallthrough
CT: control target
= control target key end

     0   :  { %7 = vsyncpa [#allocation4], 0  ;;  %s734_s0 = inlined_call_operand.hbm [shape: f32[24,300], index: 0, kind: input, shape index: {}]   ;;  %s735_s1 = inlined_call_operand.vmem [shape: s32[24,1], index: 1, kind: input, shape index: {}]   ;;  %s736_s2 = inlined_call_operand.vmem [shape: f32[32,1], index: 2, kind: output, shape index: {}]  }
   0x1   :  { %9 = vsyncpa [#allocation4 + $0x1], 0  ;;  %s594_s9 = smov 0   ;;  %s596_s10 = smov 0  }
   0x2   :  { %s598_s11 = smov 0   ;;  %s600_s12 = smov 0  }
   0x3   :  { %s602_s13 = smov 0   ;;  %s604_s14 = smov 0  }
   0x4 LB: > { %s404_s15 = sadd.s32 4294967295, %s572_s14   ;;  %s27_s16 = sadd.s32 1, %s568_s13  ;;  %s572_s14 = sphi %s604_s14, %s15_s14   ;;  %s568_s13 = sphi %s602_s13, %s743_s13   ;;  %s564_s12 = sphi %s600_s12, %s742_s12   ;;  %s560_s11 = sphi %s598_s11, %s741_s11   ;;  %s556_s10 = sphi %s596_s10, %s740_s10   ;;  %s552_s9 = sphi %s594_s9, %s739_s9  }
   0x5   : > { %p29_p0 = scmp.ge.s32.totalorder %s27_s16, 2  ;;  %s36_s17 = sadd.s32 1, %s560_s11 }
   0x6   : > { %p43_p1 = scmp.ne.s32.totalorder %s560_s11, %s556_s10  ;;  %p44_p2 = scmp.eq.s32.totalorder %s572_s14, 0 }
   0x7   : > { %s745_s16 = smov (%p29_p0, %s27_s16), 0  ;;  %p49_p4 = scmp.ne.s32.totalorder %s556_s10, %s552_s9 }
   0x8   : > { %p45_p3 = por %p44_p2, %p43_p1  ;;  %s31_s18 = ssub.s32 %s568_s13, %s745_s16 }
   0x9   : > { %p50_p5 = scmp.eq.s32.totalorder %s404_s15, 0  ;;  %p34_p6 = scmp.eq.s32.totalorder %s31_s18, 0 }
   0xa   : > { %p407_p8 = scmp.ge.s32.totalorder %s572_s14, 2 }
   0xb   : > { %p633_p7 = por %p50_p5, %p49_p4 }
   0xc   : > { %s638_s20 = scalar_select %p34_p6, %s560_s11, %s36_s17  }
   0xd   : > { %121 = sbr.rel (%p407_p8) target bundleno = 59 (0x3b), region = 16 }
  0x12   : > { %124 = sbr.rel (!%p45_p3) target bundleno = 59 (0x3b), region = 20  ;;  %s125_s21 = sand.u32 (%p45_p3), 1, %s560_s11  }
  0x13   : > { %s408_s22 = sshll.u32 (%p45_p3), %s568_s13, 1  ;;  %s422_s23 = smul.u32 (%p45_p3), 48, %s125_s21 }
  0x14   : > { %s132_s24 = ssub.s32 (%p45_p3), 3, %s408_s22  ;;  %s643_s28 = scalar_lea.sflag (%p45_p3), [#allocation4], %s125_s21 }
  0x15   : > { %p133_p9 = scmp.lt.s32.totalorder (%p45_p3), %s132_s24, 2  ;;  %s129_s29 = scalar_lea.vmem (%p45_p3), [#allocation3], %s422_s23 }
  0x17   : > { %s747_s24 = smov (!%p133_p9, %s132_s24), 2 }
  0x18   : > { %s410_s25 = smul.u32 24, %s747_s24 }
  0x1a   : > { %s137_s26 = ssub.s32 48, %s410_s25 }
  0x1b   : > { %s138_s27 = sshll.u32 %s137_s26, 4 }
  0x1c   : > { %139 = vsyncadd %s643_s28, %s138_s27  ;;  %p646_p10 = scmp.ne.s32.totalorder %s410_s25, 0  ;;  %s423_s3 = smul.u32 48, %s568_s13 }
  0x1d   : > { %s651_s4 = sshll.u32 %s129_s29, 4  ;;  %s653_s5 = smul.u32 384, %s747_s24  ;;  %s149_s4 = int_to_ptr.vmem [resolvable:$true] %s651_s4 }
  0x1e   : > { %s144_s8 = scalar_lea.hbm %s734_s0, %s423_s3  ;;  %s494_s25 = scalar_lea.hbm %s734_s0, 72 }
  0x1f   : > { %s146_s9 = sshll.u32 %s144_s8, 4  ;;  %s485_s17 = sshrl.u32 %s653_s5, 4  ;;  %s659_s9 = int_to_ptr.hbm [resolvable:$true] %s146_s9 }
  0x20   : > { %s483_s15 = sshra.s32 %s659_s9, 4  ;;  %s521_s18 = sshll.u32 %s485_s17, 4  ;;  %s484_s15 = int_to_ptr.hbm [resolvable:$true] %s483_s15 }
  0x21   : > { %p487_p11 = scmp.ne.s32.totalorder %s521_s18, %s653_s5  ;;  %s488_s21 = sadd.s32 1, %s485_s17 }
  0x23   : > { %s749_s21 = smov (!%p487_p11, %s488_s21), %s485_s17 }
  0x24   : > { %s490_s22 = scalar_lea.hbm %s484_s15, %s749_s21 }
  0x25   : > { %p491_p12 = scmp.ne.s32.totalorder %s484_s15, %s490_s22  ;;  %p496_p1 = scmp.lt.s32.totalorder %s494_s25, %s490_s22 }
  0x27   : > { %p492_p13 = pnand %p491_p12, %p646_p10 }
  0x29   : > { %p493_p0 = pneg %p492_p13 }
  0x2b   : > { %p498_p2 = pnand %p496_p1, %p493_p0 }
  0x2d   : > { %501 = shalt.err (!%p498_p2)
}
  0x2e   : > { %s502_s26 = sshra.s32 %s149_s4, 4  ;;  %s574_s29 = smov [#allocation3]   ;;  %s503_s26 = int_to_ptr.vmem [resolvable:$true] %s502_s26 }
  0x2f   : > { %s509_s27 = scalar_lea.vmem %s503_s26, %s749_s21  ;;  %s513_s3 = scalar_lea.vmem %s574_s29, 96 }
  0x30   : > { %p510_p3 = scmp.ne.s32.totalorder %s503_s26, %s509_s27  ;;  %p515_p6 = scmp.lt.s32.totalorder %s513_s3, %s509_s27 }
  0x32   : > { %p511_p4 = pnand %p510_p3, %p646_p10 }
  0x34   : > { %p512_p5 = pneg %p511_p4 }
  0x36   : > { %p517_p8 = pnand %p515_p6, %p512_p5 }
  0x38   : > { %520 = shalt.err (!%p517_p8)
}
  0x39   : > { %s575_s6 = smov 384   ;;  %s576_s7 = smov 24  }
  0x3a   : > { %154 = dma.hbm_to_vmem [thread:$0]  (%p646_p10), %s659_s9, %s653_s5, %s149_s4, %s643_s28, %s575_s6, %s575_s6, %s576_s7  }
  0x3b PF: > { %p415_p9 = scmp.ge.s32.totalorder %s572_s14, 1  ;;  %p173_p11 = scmp.lt.s32.totalorder %s572_s14, 3 }
  0x3d   : > { %p174_p12 = pnand %p415_p9, %p173_p11 }
  0x3e   : > { %s179_s8 = sand.u32 (!%p174_p12), 1, %s556_s10  }
  0x3f   : > { %177 = sbr.rel (%p174_p12) target bundleno = 344 (0x158), region = 28  ;;  %s180_s17 = scalar_lea.sflag (!%p174_p12), [#allocation4], %s179_s8 }
  0x40   : > { %s424_s15 = smul.u32 (!%p174_p12), 48, %s179_s8 }
  0x42   : > { %s683_s18 = scalar_lea.vmem (!%p174_p12), [#allocation3], %s424_s15 }
  0x44   : > { %547 = dma.done.wait (%p633_p7), %s180_s17, 768  }
  0x45   : > { %549 = vsyncadd (%p633_p7), %s180_s17, 4294966528  ;;  %s690_s28 = sshll.u32 %s564_s12, 1  ;;  %v577_v0 = vmov 0   ;;  %vm245_vm0 = vcmask 7168   ;;  %v578_v3 = vmov 0.0   ;;  %v260_v4 = vlaneseq  ;;  %v248_v8 = vld [vmem:[%s683_s18] sm:$0xff] }
  0x46   : > { %478 = vset.pattern.permute.xlu0 %v577_v0  ;;  %p226_p10 = scmp.lt.s32.totalorder %s690_s28, 2  ;;  %246 = vst.msk [vmem:[#allocation2] sm:$0xff] %vm245_vm0, %v578_v3  ;;  %v249_v9 = vld [vmem:[%s683_s18 + $0x8] sm:$0xff]  ;;  %v250_v10 = vld [vmem:[%s683_s18 + $0x10] sm:$0xff]  ;;  %vm285_vm1 = vcmask 359424   ;;  %v251_v18 = vld [vmem:[%s683_s18 + $0x18] sm:$0xff] }
  0x47   : > { %247 = vst.msk [vmem:[#allocation2 + $0x8] sm:$0xff] %vm245_vm0, %v578_v3  ;;  %v261_v5 = vand.u32 127, %v260_v4  ;;  %v252_v19 = vld [vmem:[%s683_s18 + $0x20] sm:$0xff]  ;;  %v253_v20 = vld [vmem:[%s683_s18 + $0x28] sm:$0xff]  ;;  %p236_p7 = scmp.lt.s32.totalorder %s690_s28, 3 }
  0x48   : > { %s227_s30 = scalar_select %p226_p10, %s690_s28, 2 }
  0x49   : > { %v262_v6 = vadd.s32 128, %v261_v5  ;;  %v263_v7 = vadd.s32 256, %v261_v5  ;;  %s751_s28 = smov (!%p236_p7, %s690_s28), 3 }
  0x4a   : > { %s417_s4 = sshll.u32 %s227_s30, 3  ;;  %s419_s12 = sshll.u32 %s751_s28, 3 }
  0x4b   : > { %s229_s21 = scalar_lea.vmem %s735_s1, %s417_s4  ;;  %s239_s23 = scalar_lea.vmem %s736_s2, %s419_s12 }
  0x4c   : > { %v254_v1 = vld [vmem:[%s229_s21] sm:$0xff]  ;;  %v255_v2 = vld [vmem:[%s229_s21 + $0x8] sm:$0xff] }
  0x4d   : > { %265 = vperm.xlu0 %478, %v254_v1   ;;  %v282_v28 = vld [vmem:[#allocation2] sm:$0xff] }
  0x4e   : > { %v283_v31 = vld [vmem:[#allocation2 + $0x8] sm:$0xff] }
  0x55   : > { %268 = vperm.xlu0 %478, %v255_v2  }
  0xbf   : > { %v266_v11 = vpop.permute.xlu0 %265 }
  0xc0   : > { %vm270_vm2 = vcmp.eq.s32.totalorder %v261_v5, %v266_v11  ;;  %vm271_vm3 = vcmp.eq.s32.totalorder %v262_v6, %v266_v11  ;;  %vm272_vm4 = vcmp.eq.s32.totalorder %v263_v7, %v266_v11 }
  0xc1   : > { %v276_v12 = vsel %vm270_vm2, %v248_v8, 0.0  ;;  %v277_v13 = vsel %vm271_vm3, %v249_v9, 0.0  ;;  %v278_v14 = vsel %vm272_vm4, %v250_v10, 0.0 }
  0xc2   : > { %v284_v15 = vadd.f32 %v277_v13, %v276_v12  ;;  %v286_v16 = vsel %vm285_vm1, %v278_v14, 0.0 }
  0xc4   : > { %v287_v17 = vadd.f32 %v286_v16, %v284_v15 }
  0xc6   : > { %288 = vadd.xlane.f32.xlu1 %v287_v17 }
  0xc7   : > { %v269_v21 = vpop.permute.xlu0 %268 }
  0xc8   : > { %vm273_vm5 = vcmp.eq.s32.totalorder %v261_v5, %v269_v21  ;;  %vm274_vm6 = vcmp.eq.s32.totalorder %v262_v6, %v269_v21  ;;  %vm275_vm7 = vcmp.eq.s32.totalorder %v263_v7, %v269_v21 }
  0xc9   : > { %v279_v22 = vsel %vm273_vm5, %v251_v18, 0.0  ;;  %v280_v23 = vsel %vm274_vm6, %v252_v19, 0.0  ;;  %v281_v24 = vsel %vm275_vm7, %v253_v20, 0.0 }
  0xca   : > { %v290_v25 = vadd.f32 %v280_v23, %v279_v22  ;;  %v291_v26 = vsel %vm285_vm1, %v281_v24, 0.0 }
  0xcc   : > { %v292_v27 = vadd.f32 %v291_v26, %v290_v25 }
  0xce   : > { %293 = vadd.xlane.f32.xlu1 %v292_v27 }
 0x139   : > { %v289_v29 = vpop.xlane.xlu1 %288 }
 0x13a   : > { %v295_v30 = vadd.f32 %v289_v29, %v282_v28 }
 0x13c   : > { %298 = vst.msk [vmem:[#allocation2] sm:$0xff] %vm245_vm0, %v295_v30 }
 0x141   : > { %v294_v32 = vpop.xlane.xlu1 %293 }
 0x142   : > { %v296_v33 = vadd.f32 %v294_v32, %v283_v31 }
 0x143   : > { %v303_v34 = vld [vmem:[#allocation2] sm:$0xff] }
 0x144   : > { %479 = vlog2.f32 %v303_v34  ;;  %299 = vst.msk [vmem:[#allocation2 + $0x8] sm:$0xff] %vm245_vm0, %v296_v33 }
 0x14a   : > { %v480_v35 = vpop.eup %479 }
 0x14b   : > { %v306_v36 = vmul.f32 0.6931472, %v480_v35  ;;  %v304_v37 = vld [vmem:[#allocation2 + $0x8] sm:$0xff] }
 0x14c   : > { %481 = vlog2.f32 %v304_v37 }
 0x14d   : > { %v309_v38 = vsub.f32 0.0, %v306_v36 }
 0x14f   : > { %311 = vst.msk [vmem:[%s239_s23] sm:$0xff] %vm245_vm0, %v309_v38 }
 0x152   : > { %v482_v39 = vpop.eup %481 }
 0x153   : > { %v308_v40 = vmul.f32 0.6931472, %v482_v39 }
 0x155   : > { %v310_v41 = vsub.f32 0.0, %v308_v40 }
 0x157   : > { %312 = vst.msk [vmem:[%s239_s23 + $0x8] sm:$0xff] %vm245_vm0, %v310_v41 }
 0x158 PF: > { %s15_s14 = sadd.s32 1, %s572_s14   ;;  %s739_s9 = smov %s556_s10 }
 0x159   : > { %p12_p13 = scmp.ge.s32.totalorder %s15_s14, 4   ;;  %s740_s10 = smov %s560_s11 }
 0x15a   : > { %s741_s11 = smov %s638_s20  ;;  %s742_s12 = smov %s568_s13 }
 0x15b   : > { %s743_s13 = smov %s745_s16  ;;  %14 = sbr.rel (!%p12_p13) target bundleno = 4 (0x4), region = 79 }
 0x160   :  { %335 = vsyncpa [#allocation4], 1 }
 0x161   :  { %337 = vsyncpa [#allocation4 + $0x1], 1 }

</bundles_post_ra>
